<compile_context>
chip_gen: v7x
topology: tpu7x:2x2x1
jax: 0.10.0
libtpu: 0.0.40
codegen_flags: <defaults>
</compile_context>

<pallas_src>
import jax
import jax.numpy as jnp
from jax.experimental import pallas as pl
from jax.experimental.pallas import tpu as pltpu


def model_kernel(x_ref, w_ref, b_ref, o_ref):
    # x_ref: (1, 2, 2)  tokens (sublanes) x in_features (lanes)
    # w_ref: (2, 2)     (out_features, in_features)  -- PyTorch layout, untransposed
    # b_ref: (1, 2)     bias
    # o_ref: (8, 2)     final output
    x = x_ref[0]                                   # (2, 2)
    w = w_ref[...]                                 # (2, 2)
    b = b_ref[...]                                 # (1, 2)

    x0 = x[:, 0:1]                                 # (2, 1)
    x1 = x[:, 1:2]                                 # (2, 1)

    # Linear on the VPU (no MXU, no transpose):
    #   t_o = x[:,0]*W[o,0] + x[:,1]*W[o,1] + b[o] + 1        (already + 1)
    t0 = x0 * w[0:1, 0:1] + x1 * w[0:1, 1:2] + b[0:1, 0:1] + 1.0   # (2, 1)
    t1 = x0 * w[1:2, 0:1] + x1 * w[1:2, 1:2] + b[0:1, 1:2] + 1.0   # (2, 1)

    # .pow(-2).prod(-1) == 1 / (t0*t1)^2   ->  a = (t0*t1)^2
    tt = t0 * t1                                   # (2, 1)
    a = tt * tt                                    # (2, 1)
    # clamp(1/a, min=1e-15)  <=>  clamp(a, max=1e15)   (a >= 0 always)
    a = jnp.minimum(a, 1e15)
    # .add(1.0).reciprocal().add(1e-15):  1/(1/a + 1) == a/(a + 1)  (exact divide)
    yhat2 = a / (a + 1.0) + 1e-15                  # (2, 1) per-token value

    # repeat(2,2).flatten() then stack(.., dim=1):  out[i, j] = yhat2[i % 2]
    pair = jnp.broadcast_to(yhat2, (2, 2))         # lane broadcast
    o_ref[...] = jnp.concatenate([pair, pair, pair, pair], axis=0)  # (8, 2)


def model_forward(x, weight, bias):
    # x: (1, 2, 2); weight: (2, 2) (out, in); bias: (2,)
    b2d = bias.reshape(1, -1)                      # trivial metadata reshape only
    return pl.pallas_call(
        model_kernel,
        out_shape=jax.ShapeDtypeStruct((8, 2), jnp.float32),
        in_specs=[
            pl.BlockSpec(memory_space=pltpu.MemorySpace.VMEM),   # x
            pl.BlockSpec(memory_space=pltpu.MemorySpace.VMEM),   # weight
            pl.BlockSpec(memory_space=pltpu.MemorySpace.VMEM),   # bias
        ],
        out_specs=pl.BlockSpec(memory_space=pltpu.MemorySpace.VMEM),
        cost_estimate=pl.CostEstimate(flops=32, transcendentals=0,
                                      bytes_accessed=192),
    )(x, weight, b2d)


def model_forward_ref(x, weight, bias):
    # Pure-JAX reference mirroring the PyTorch graph.
    # (If the surrounding model is JAX, prefer fusing this directly into the
    #  caller's jit over the standalone Pallas call.)
    y = jnp.einsum("bsf,of->bso", x, weight,
                   precision=jax.lax.Precision.HIGHEST) + bias      # Linear
    z = (y + 1.0) ** -2                                             # pow(-2)
    p = jnp.maximum(jnp.prod(z, axis=-1), 1e-15)                    # (1, 2)
    rep = jnp.tile(p, (2, 2)).reshape(-1)                           # (8,)
    yhat_p1 = 1.0 / (rep + 1.0) + 1e-15
    return jnp.stack((yhat_p1, yhat_p1), axis=1)                    # (8, 2)


if __name__ == "__main__":
    key = jax.random.PRNGKey(0)
    kx, kw, kb = jax.random.split(key, 3)

    # Input matching torch.randn(1, 2, 2)
    x = jax.random.normal(kx, (1, 2, 2), dtype=jnp.float32)

    # Deterministic Linear(2, 2) params (torch default: U(-1/sqrt(in), 1/sqrt(in)))
    bound = 1.0 / jnp.sqrt(2.0)
    weight = jax.random.uniform(kw, (2, 2), jnp.float32, -bound, bound)
    bias = jax.random.uniform(kb, (2,), jnp.float32, -bound, bound)

    out = jax.block_until_ready(model_forward(x, weight, bias))

    ref = model_forward_ref(x, weight, bias)
    assert out.shape == (8, 2)
    assert jnp.allclose(out, ref, rtol=1e-5, atol=1e-6), (out, ref)

    print("KERNEL_OK")
</pallas_src>

<mosaic_0001>
module attributes {stable_mosaic.version = 11 : i64} {
  func.func @model_kernel(%arg0: memref<1x2x2xf32, #tpu.memory_space<vmem>>, %arg1: memref<2x2xf32, #tpu.memory_space<vmem>>, %arg2: memref<1x2xf32, #tpu.memory_space<vmem>>, %arg3: memref<8x2xf32, #tpu.memory_space<vmem>>) attributes {dimension_semantics = [], scalar_prefetch = 0 : i64, scratch_operands = 0 : i64, tpu.core_type = #tpu.core_type<tc>} {
    %c0 = arith.constant 0 : index
    %c0_0 = arith.constant 0 : index
    %c0_1 = arith.constant 0 : index
    %0 = vector.load %arg0[%c0, %c0_0, %c0_1] : memref<1x2x2xf32, #tpu.memory_space<vmem>>, vector<1x2x2xf32>
    %1 = vector.shape_cast %0 : vector<1x2x2xf32> to vector<2x2xf32>
    %c0_2 = arith.constant 0 : index
    %c0_3 = arith.constant 0 : index
    %2 = vector.load %arg1[%c0_2, %c0_3] : memref<2x2xf32, #tpu.memory_space<vmem>>, vector<2x2xf32>
    %c0_4 = arith.constant 0 : index
    %c0_5 = arith.constant 0 : index
    %3 = vector.load %arg2[%c0_4, %c0_5] : memref<1x2xf32, #tpu.memory_space<vmem>>, vector<1x2xf32>
    %4 = vector.extract_strided_slice %1 {offsets = [0, 0], sizes = [2, 1], strides = [1, 1]} : vector<2x2xf32> to vector<2x1xf32>
    %5 = vector.extract_strided_slice %1 {offsets = [0, 1], sizes = [2, 1], strides = [1, 1]} : vector<2x2xf32> to vector<2x1xf32>
    %6 = vector.extract_strided_slice %2 {offsets = [0, 0], sizes = [1, 1], strides = [1, 1]} : vector<2x2xf32> to vector<1x1xf32>
    %7 = vector.broadcast %6 : vector<1x1xf32> to vector<2x1xf32>
    %8 = arith.mulf %4, %7 : vector<2x1xf32>
    %9 = vector.extract_strided_slice %2 {offsets = [0, 1], sizes = [1, 1], strides = [1, 1]} : vector<2x2xf32> to vector<1x1xf32>
    %10 = vector.broadcast %9 : vector<1x1xf32> to vector<2x1xf32>
    %11 = arith.mulf %5, %10 : vector<2x1xf32>
    %12 = arith.addf %8, %11 : vector<2x1xf32>
    %13 = vector.extract_strided_slice %3 {offsets = [0, 0], sizes = [1, 1], strides = [1, 1]} : vector<1x2xf32> to vector<1x1xf32>
    %14 = vector.broadcast %13 : vector<1x1xf32> to vector<2x1xf32>
    %15 = arith.addf %12, %14 : vector<2x1xf32>
    %cst = arith.constant 1.000000e+00 : f32
    %16 = vector.broadcast %cst : f32 to vector<2x1xf32>
    %17 = arith.addf %15, %16 : vector<2x1xf32>
    %18 = vector.extract_strided_slice %2 {offsets = [1, 0], sizes = [1, 1], strides = [1, 1]} : vector<2x2xf32> to vector<1x1xf32>
    %19 = vector.broadcast %18 : vector<1x1xf32> to vector<2x1xf32>
    %20 = arith.mulf %4, %19 : vector<2x1xf32>
    %21 = vector.extract_strided_slice %2 {offsets = [1, 1], sizes = [1, 1], strides = [1, 1]} : vector<2x2xf32> to vector<1x1xf32>
    %22 = vector.broadcast %21 : vector<1x1xf32> to vector<2x1xf32>
    %23 = arith.mulf %5, %22 : vector<2x1xf32>
    %24 = arith.addf %20, %23 : vector<2x1xf32>
    %25 = vector.extract_strided_slice %3 {offsets = [0, 1], sizes = [1, 1], strides = [1, 1]} : vector<1x2xf32> to vector<1x1xf32>
    %26 = vector.broadcast %25 : vector<1x1xf32> to vector<2x1xf32>
    %27 = arith.addf %24, %26 : vector<2x1xf32>
    %cst_6 = arith.constant 1.000000e+00 : f32
    %28 = vector.broadcast %cst_6 : f32 to vector<2x1xf32>
    %29 = arith.addf %27, %28 : vector<2x1xf32>
    %30 = arith.mulf %17, %29 : vector<2x1xf32>
    %31 = arith.mulf %30, %30 : vector<2x1xf32>
    %cst_7 = arith.constant 9.99999986E+14 : f32
    %32 = vector.broadcast %cst_7 : f32 to vector<2x1xf32>
    %33 = arith.minimumf %31, %32 : vector<2x1xf32>
    %cst_8 = arith.constant 1.000000e+00 : f32
    %34 = vector.broadcast %cst_8 : f32 to vector<2x1xf32>
    %35 = arith.addf %33, %34 : vector<2x1xf32>
    %36 = arith.divf %33, %35 : vector<2x1xf32>
    %cst_9 = arith.constant 1.000000e-15 : f32
    %37 = vector.broadcast %cst_9 : f32 to vector<2x1xf32>
    %38 = arith.addf %36, %37 : vector<2x1xf32>
    %39 = vector.shape_cast %38 : vector<2x1xf32> to vector<2x1xf32>
    %40 = vector.broadcast %39 : vector<2x1xf32> to vector<2x2xf32>
    %41 = tpu.concatenate %40, %40, %40, %40 in 0 : vector<2x2xf32>, vector<2x2xf32>, vector<2x2xf32>, vector<2x2xf32> -> vector<8x2xf32>
    %c0_10 = arith.constant 0 : index
    %c0_11 = arith.constant 0 : index
    %42 = vector.load %arg3[%c0_10, %c0_11] : memref<8x2xf32, #tpu.memory_space<vmem>>, vector<8x2xf32>
    tpu.vector_store %arg3[%c0_10, %c0_11], %41 {strides = array<i32>} : memref<8x2xf32, #tpu.memory_space<vmem>>, vector<8x2xf32>,
    return
  }
}

</mosaic_0001>

<bundles_post_ra>
// kernel: tpu_custom_call.1
= control target key start
LH: loop header
LB: loop body
LE: loop exit
PB: predicated region body
PF: predicated region fallthrough
CT: control target
= control target key end

     0   :  { %8 = vsyncpa [#allocation3], 0  ;;  %s125_s12 = smov [#allocation2]   ;;  %s169_s0 = inlined_call_operand.hbm [shape: f32[1,2,2], index: 0, kind: input, shape index: {}]   ;;  %s170_s1 = inlined_call_operand.vmem [shape: f32[2,2], index: 1, kind: input, shape index: {}]   ;;  %s171_s2 = inlined_call_operand.vmem [shape: f32[1,2], index: 2, kind: input, shape index: {}]   ;;  %s172_s3 = inlined_call_operand.vmem [shape: f32[8,2], index: 3, kind: output, shape index: {}]  }
   0x1   :  { %s15_s13 = sshll.u32 %s125_s12, 4  ;;  %s101_s16 = scalar_lea.hbm %s169_s0, 32  ;;  %s16_s13 = int_to_ptr.vmem [resolvable:$true] %s15_s13 }
   0x2   :  { %p102_p0 = scmp.ne.s32.totalorder %s169_s0, %s101_s16  ;;  %p105_p1 = scmp.lt.u32.totalorder %s101_s16, %s169_s0 }
   0x4   :  { %p107_p2 = pnand %p105_p1, %p102_p0 }
   0x6   :  { %110 = shalt.err (!%p107_p2)
}
   0x7   :  { %s111_s21 = scalar_lea.vmem %s16_s13, 32  ;;  %p116_p4 = scmp.lt.s32.totalorder %s16_s13, %s16_s13 }
   0x8   :  { %p112_p3 = scmp.ne.s32.totalorder %s16_s13, %s111_s21  ;;  %p117_p5 = scmp.lt.s32.totalorder %s111_s21, %s111_s21 }
   0xa   :  { %p118_p6 = por %p117_p5, %p116_p4 }
   0xc   :  { %p119_p7 = pnand %p118_p6, %p112_p3 }
   0xe   :  { %122 = shalt.err (!%p119_p7)
}
   0xf   :  { %18 = dma.hbm_to_vmem [thread:$0]  %s169_s0, 32, %s16_s13, [#allocation3]  }
  0x10   :  { %123 = dma.done.wait [#allocation3], 32  }
  0x11   :  { %124 = vsyncadd [#allocation3], 4294967264  ;;  %v29_v0 = vlaneseq  ;;  %v26_v4 = vld [vmem:[#allocation2] sm:$0x3]  ;;  %v27_v5 = vld [vmem:[%s170_s1] sm:$0x3] }
  0x12   :  { %v93_v6 = vld [vmem:[%s171_s2] ss:$0 sm:$0xff]  ;;  %s126_s28 = smov 127   ;;  %v127_v11 = vmov 0   ;;  %vm80_vm0 = vcmask 1041408   ;;  %vm82_vm1 = vcmask 1043456  }
  0x13   :  { %v30_v1 = vshrl.u32 %v29_v0, 7  ;;  %57 = vrot.lane.b32.xlu1 %v93_v6, %s126_s28  ;;  %98 = vset.pattern.permute.xlu0 %v127_v11  ;;  %vm84_vm2 = vcmask 1045504   ;;  %vm86_vm3 = vcmask 15360  }
  0x14   :  { %97 = vset.pattern.permute.xlu1 %v127_v11 }
  0x15   :  { %v31_v2 = vsub.s32 0, %v30_v1  ;;  %v49_v3 = vsub.s32 1, %v30_v1 }
  0x17   :  { %v32_v7 = vrot.slane %v27_v5, %v31_v2  ;;  %v50_v8 = vrot.slane %v27_v5, %v49_v3 }
  0x19   :  { %v33_v9 = vmul.f32 %v32_v7, %v26_v4  ;;  %v51_v10 = vmul.f32 %v50_v8, %v26_v4 }
  0x1b   :  { %35 = vrot.lane.b32.xlu0 %v33_v9, %s126_s28 }
  0x1f   :  { %53 = vrot.lane.b32.xlu0 %v51_v10, %s126_s28 }
  0x85   :  { %v58_v15 = vpop.permute.xlu1 %57 }
  0x8d   :  { %v36_v12 = vpop.permute.xlu0 %35 }
  0x8e   :  { %v38_v13 = vadd.f32 %v36_v12, %v33_v9 }
  0x90   :  { %v45_v16 = vadd.f32 %v93_v6, %v38_v13 }
  0x91   :  { %v54_v14 = vpop.permute.xlu0 %53 }
  0x92   :  { %v56_v17 = vadd.f32 %v54_v14, %v51_v10  ;;  %v46_v19 = vadd.f32 1.0, %v45_v16 }
  0x94   :  { %v60_v18 = vadd.f32 %v58_v15, %v56_v17 }
  0x96   :  { %v61_v20 = vadd.f32 1.0, %v60_v18 }
  0x98   :  { %v62_v21 = vmul.f32 %v61_v20, %v46_v19 }
  0x9a   :  { %v63_v22 = vmul.f32 %v62_v21, %v62_v21 }
  0x9c   :  { %v64_v23 = vmin.f32 %v63_v22, 1e+15 }
  0x9e   :  { %v65_v24 = vadd.f32 1.0, %v64_v23 }
  0xa0   :  { %99 = vrcp.f32 %v65_v24 }
  0xaa   :  { %v100_v25 = vpop.eup %99 }
  0xab   :  { %v67_v26 = vmul.f32 %v100_v25, %v64_v23 }
  0xad   :  { %v68_v27 = vadd.f32 1e-15, %v67_v26 }
  0xaf   :  { %71 = vperm.xlu1 %97, %v68_v27  }
 0x12e   :  { %v72_v28 = vpop.permute.xlu1 %71 }
 0x12f   :  { %v74_v29 = vrot.slane %v72_v28, 6  ;;  %v76_v30 = vrot.slane %v72_v28, 4  ;;  %v78_v31 = vrot.slane %v72_v28, 2 }
 0x131   :  { %v81_v32 = vsel %vm80_vm0, %v72_v28, %v74_v29 }
 0x132   :  { %v83_v33 = vsel %vm82_vm1, %v81_v32, %v76_v30 }
 0x133   :  { %v85_v34 = vsel %vm84_vm2, %v83_v33, %v78_v31 }
 0x134   :  { %87 = vst.msk [vmem:[%s172_s3] sm:$0xff] %vm86_vm3, %v85_v34 }
 0x135   :  { %92 = vsyncpa [#allocation3], 1 }

</bundles_post_ra>
